<compile_context>
chip_gen: v7x
topology: tpu7x:2x2x1
jax: 0.10.0
libtpu: 0.0.40
codegen_flags: <defaults>
</compile_context>

<pallas_src>
import numpy as np
import jax
import jax.numpy as jnp
from jax.experimental import pallas as pl
from jax.experimental.pallas import tpu as pltpu


SLAB_LANES = 128      # lane-aligned slab / output width
OUT_LANES = 128       # lane-dense padded output width


# --------------------------- single-slab layout -------------------------------
def _round_up(x, m):
    return (x + m - 1) // m * m


def make_layout(n_nodes, n_in, dims):
    """Single input slab [total_rows, 128] f32:
         rows [0, N)            : a_hat in lanes [0, N), x in lanes [N, N+n_in)
         rows [N, N + max_fi)   : all weight blocks, layer l in its lane band
         row   N + max_fi       : all biases (same lane bands as their weights)
    """
    assert n_nodes + n_in <= SLAB_LANES
    lane, layers = 0, []
    for fi, fo in dims:
        layers.append((lane, fi, fo))
        lane += fo
    assert lane <= SLAB_LANES
    w_row = n_nodes
    bias_row = w_row + max(fi for fi, _ in dims)
    total_rows = _round_up(bias_row + 1, 8)
    return dict(n=n_nodes, n_in=n_in, w_row=w_row, bias_row=bias_row,
                layers=tuple(layers), total_rows=total_rows)


def pack_param_rows(params, layout):
    """Static parameter rows of the slab (numpy, built once)."""
    rows = layout["total_rows"] - layout["n"]
    block = np.zeros((rows, SLAB_LANES), np.float32)
    b_row = layout["bias_row"] - layout["n"]
    for (w, b), (lane, fi, fo) in zip(params, layout["layers"]):
        block[0:fi, lane:lane + fo] = np.asarray(w)
        block[b_row, lane:lane + fo] = np.asarray(b)
    return jnp.asarray(block)


# ------------------------------- Pallas kernel --------------------------------
def make_net_kernel(layout):
    """Kernel closure over the static slab layout (all slices are static)."""
    n, n_in = layout["n"], layout["n_in"]
    w_row, b_row = layout["w_row"], layout["bias_row"]
    l1, l2, l3, l4 = layout["layers"]

    def net_kernel(slab_ref, out_ref):
        slab = slab_ref[...]                       # one [total_rows, 128] f32 load
        a = slab[0:n, 0:n]                         # [N, N] normalized adjacency
        h = slab[0:n, n:n + n_in]                  # [N, n_in] node features

        def gcn(h, lane, fi, fo):
            w = slab[w_row:w_row + fi, lane:lane + fo]       # [fi, fo]
            b = slab[b_row:b_row + 1, lane:lane + fo]        # [1,  fo]
            hw = jnp.dot(h, w, preferred_element_type=jnp.float32)    # X @ W
            agg = jnp.dot(a, hw, preferred_element_type=jnp.float32)  # A_hat @ (XW)
            return agg + b                                   # GCNConv bias

        h = jnp.tanh(gcn(h, *l1))                  # [N, 32]
        h = jnp.tanh(gcn(h, *l2))                  # [N, 4]
        h = jnp.tanh(gcn(h, *l3))                  # [N, 2]  -> first output "x"
        y = gcn(h, *l4)                            # [N, 4]

        # numerically-stable log_softmax along the feature axis
        m = jnp.max(y, axis=1, keepdims=True)
        s = y - m
        lse = jnp.log(jnp.sum(jnp.exp(s), axis=1, keepdims=True))
        logp = s - lse

        # lane-dense [N, 128] writeback: zero-fill once, then direct slice stores
        out_ref[...] = jnp.zeros_like(out_ref)
        out_ref[:, 0:2] = h
        out_ref[:, 2:6] = logp

    return net_kernel


def net_forward(a_hat, x, param_rows, layout):
    n, n_in = layout["n"], layout["n_in"]
    total_rows = layout["total_rows"]

    # Pack a_hat and x side-by-side into the data rows of the single slab.
    data = jnp.zeros((n, SLAB_LANES), jnp.float32)
    data = data.at[:, 0:n].set(a_hat)
    data = data.at[:, n:n + n_in].set(x)
    slab = jnp.concatenate([data, param_rows], axis=0)   # [total_rows, 128]

    vmem = pl.BlockSpec(memory_space=pltpu.MemorySpace.VMEM)
    flops = int(2 * n * n * (32 + 4 + 2 + 4)
                + 2 * n * (n_in * 32 + 32 * 4 + 4 * 2 + 2 * 4))
    transcendentals = int(n * (32 + 4 + 2) + n * 4 + n)   # tanh + exp + log
    bytes_accessed = int(4 * (total_rows * SLAB_LANES + n * OUT_LANES))

    out = pl.pallas_call(
        make_net_kernel(layout),
        out_shape=jax.ShapeDtypeStruct((n, OUT_LANES), jnp.float32),
        in_specs=[vmem],
        out_specs=vmem,
        cost_estimate=pl.CostEstimate(flops=flops,
                                      transcendentals=transcendentals,
                                      bytes_accessed=bytes_accessed),
    )(slab)
    return out[:, :2], out[:, 2:6]


# ------------------------------- plain-JAX glue --------------------------------
def gcn_norm_dense(edge_index, num_nodes):
    """Dense D^-1/2 (A + I) D^-1/2 matching PyG GCNConv defaults.
    (Assumes the edge list is coalesced and has no pre-existing self loops.)"""
    src, dst = edge_index[0], edge_index[1]
    adj = jnp.zeros((num_nodes, num_nodes), jnp.float32)
    adj = adj.at[dst, src].add(1.0)                    # message j -> i lands in row i
    adj = adj + jnp.eye(num_nodes, dtype=jnp.float32)  # add self loops
    deg = jnp.sum(adj, axis=1)
    dinv = jnp.where(deg > 0, 1.0 / jnp.sqrt(deg), 0.0)
    return adj * dinv[:, None] * dinv[None, :]


def init_params(key, n_in):
    dims = [(n_in, 32), (32, 4), (4, 2), (2, 4)]
    params = []
    for fi, fo in dims:
        key, kw = jax.random.split(key)
        scale = jnp.sqrt(6.0 / (fi + fo))              # glorot-uniform-ish
        w = jax.random.uniform(kw, (fi, fo), jnp.float32, -scale, scale)
        b = jnp.zeros((fo,), jnp.float32)
        params.append((w, b))
    return params, dims


def reference_forward(a_hat, x, params):
    """Pure-JAX reference of Net.forward (dense GCNConv)."""
    h = x
    out_x = None
    for i, (w, b) in enumerate(params):
        h = a_hat @ (h @ w) + b
        if i < 3:
            h = jnp.tanh(h)
        if i == 2:
            out_x = h
    return out_x, jax.nn.log_softmax(h, axis=1)


if __name__ == "__main__":
    N = 16        # number of graph nodes
    n_in = 8      # input feature dim (the "n" argument of Net)

    # deterministic scale-free-ish edge list (ring + chords), no self loops
    src = list(range(N)) + [i for i in range(2, N)]
    dst = [(i + 1) % N for i in range(N)] + [0] * (N - 2)
    edge_index = jnp.array([src, dst], dtype=jnp.int32)

    key = jax.random.PRNGKey(0)
    key, kx = jax.random.split(key)
    x = jax.random.normal(kx, (N, n_in), jnp.float32)
    params, dims = init_params(key, n_in)

    layout = make_layout(N, n_in, dims)
    param_rows = pack_param_rows(params, layout)
    a_hat = gcn_norm_dense(edge_index, N)

    fwd = jax.jit(lambda a, feat, prows: net_forward(a, feat, prows, layout))
    out_x, out_y = fwd(a_hat, x, param_rows)
    jax.block_until_ready((out_x, out_y))

    assert out_x.shape == (N, 2) and out_y.shape == (N, 4)
    # log_softmax rows must (exp-)sum to ~1
    assert np.allclose(np.exp(np.asarray(out_y)).sum(axis=1), 1.0, atol=1e-5)
    # match the pure-JAX (f32) reference
    ref_x, ref_y = reference_forward(a_hat, x, params)
    assert np.allclose(np.asarray(out_x), np.asarray(ref_x), atol=5e-2)
    assert np.allclose(np.asarray(out_y), np.asarray(ref_y), atol=5e-2)
    print("KERNEL_OK")
</pallas_src>

<mosaic_0001>
module attributes {stable_mosaic.version = 11 : i64} {
  func.func @net_kernel(%arg0: memref<56x128xf32, #tpu.memory_space<vmem>>, %arg1: memref<16x128xf32, #tpu.memory_space<vmem>>) attributes {dimension_semantics = [], scalar_prefetch = 0 : i64, scratch_operands = 0 : i64, tpu.core_type = #tpu.core_type<tc>} {
    %c0 = arith.constant 0 : index
    %c0_0 = arith.constant 0 : index
    %0 = vector.load %arg0[%c0, %c0_0] : memref<56x128xf32, #tpu.memory_space<vmem>>, vector<56x128xf32>
    %1 = vector.extract_strided_slice %0 {offsets = [0, 0], sizes = [16, 16], strides = [1, 1]} : vector<56x128xf32> to vector<16x16xf32>
    %2 = vector.extract_strided_slice %0 {offsets = [0, 16], sizes = [16, 8], strides = [1, 1]} : vector<56x128xf32> to vector<16x8xf32>
    %3 = vector.extract_strided_slice %0 {offsets = [16, 0], sizes = [8, 32], strides = [1, 1]} : vector<56x128xf32> to vector<8x32xf32>
    %4 = vector.extract_strided_slice %0 {offsets = [48, 0], sizes = [1, 32], strides = [1, 1]} : vector<56x128xf32> to vector<1x32xf32>
    %cst = arith.constant dense<0.000000e+00> : vector<16x32xf32>
    %5 = tpu.matmul %2, %3, %cst {dimension_numbers = #tpu.dot_dimension_numbers<[1], [0], [0], [1], [0, 0, 1, 1], [], []>} : vector<16x8xf32>, vector<8x32xf32>, vector<16x32xf32> -> vector<16x32xf32>
    %cst_1 = arith.constant dense<0.000000e+00> : vector<16x32xf32>
    %6 = tpu.matmul %1, %5, %cst_1 {dimension_numbers = #tpu.dot_dimension_numbers<[1], [0], [0], [1], [0, 0, 1, 1], [], []>} : vector<16x16xf32>, vector<16x32xf32>, vector<16x32xf32> -> vector<16x32xf32>
    %7 = vector.broadcast %4 : vector<1x32xf32> to vector<16x32xf32>
    %8 = arith.addf %6, %7 : vector<16x32xf32>
    %9 = math.tanh %8 : vector<16x32xf32>
    %10 = vector.extract_strided_slice %0 {offsets = [16, 32], sizes = [32, 4], strides = [1, 1]} : vector<56x128xf32> to vector<32x4xf32>
    %11 = vector.extract_strided_slice %0 {offsets = [48, 32], sizes = [1, 4], strides = [1, 1]} : vector<56x128xf32> to vector<1x4xf32>
    %cst_2 = arith.constant dense<0.000000e+00> : vector<16x4xf32>
    %12 = tpu.matmul %9, %10, %cst_2 {dimension_numbers = #tpu.dot_dimension_numbers<[1], [0], [0], [1], [0, 0, 1, 1], [], []>} : vector<16x32xf32>, vector<32x4xf32>, vector<16x4xf32> -> vector<16x4xf32>
    %cst_3 = arith.constant dense<0.000000e+00> : vector<16x4xf32>
    %13 = tpu.matmul %1, %12, %cst_3 {dimension_numbers = #tpu.dot_dimension_numbers<[1], [0], [0], [1], [0, 0, 1, 1], [], []>} : vector<16x16xf32>, vector<16x4xf32>, vector<16x4xf32> -> vector<16x4xf32>
    %14 = vector.broadcast %11 : vector<1x4xf32> to vector<16x4xf32>
    %15 = arith.addf %13, %14 : vector<16x4xf32>
    %16 = math.tanh %15 : vector<16x4xf32>
    %17 = vector.extract_strided_slice %0 {offsets = [16, 36], sizes = [4, 2], strides = [1, 1]} : vector<56x128xf32> to vector<4x2xf32>
    %18 = vector.extract_strided_slice %0 {offsets = [48, 36], sizes = [1, 2], strides = [1, 1]} : vector<56x128xf32> to vector<1x2xf32>
    %cst_4 = arith.constant dense<0.000000e+00> : vector<16x2xf32>
    %19 = tpu.matmul %16, %17, %cst_4 {dimension_numbers = #tpu.dot_dimension_numbers<[1], [0], [0], [1], [0, 0, 1, 1], [], []>} : vector<16x4xf32>, vector<4x2xf32>, vector<16x2xf32> -> vector<16x2xf32>
    %cst_5 = arith.constant dense<0.000000e+00> : vector<16x2xf32>
    %20 = tpu.matmul %1, %19, %cst_5 {dimension_numbers = #tpu.dot_dimension_numbers<[1], [0], [0], [1], [0, 0, 1, 1], [], []>} : vector<16x16xf32>, vector<16x2xf32>, vector<16x2xf32> -> vector<16x2xf32>
    %21 = vector.broadcast %18 : vector<1x2xf32> to vector<16x2xf32>
    %22 = arith.addf %20, %21 : vector<16x2xf32>
    %23 = math.tanh %22 : vector<16x2xf32>
    %24 = vector.extract_strided_slice %0 {offsets = [16, 38], sizes = [2, 4], strides = [1, 1]} : vector<56x128xf32> to vector<2x4xf32>
    %25 = vector.extract_strided_slice %0 {offsets = [48, 38], sizes = [1, 4], strides = [1, 1]} : vector<56x128xf32> to vector<1x4xf32>
    %cst_6 = arith.constant dense<0.000000e+00> : vector<16x4xf32>
    %26 = tpu.matmul %23, %24, %cst_6 {dimension_numbers = #tpu.dot_dimension_numbers<[1], [0], [0], [1], [0, 0, 1, 1], [], []>} : vector<16x2xf32>, vector<2x4xf32>, vector<16x4xf32> -> vector<16x4xf32>
    %cst_7 = arith.constant dense<0.000000e+00> : vector<16x4xf32>
    %27 = tpu.matmul %1, %26, %cst_7 {dimension_numbers = #tpu.dot_dimension_numbers<[1], [0], [0], [1], [0, 0, 1, 1], [], []>} : vector<16x16xf32>, vector<16x4xf32>, vector<16x4xf32> -> vector<16x4xf32>
    %28 = vector.broadcast %25 : vector<1x4xf32> to vector<16x4xf32>
    %29 = arith.addf %27, %28 : vector<16x4xf32>
    %cst_8 = arith.constant dense<0xFF800000> : vector<16xf32>
    %30 = vector.multi_reduction <maximumf>, %29, %cst_8 [1] : vector<16x4xf32> to vector<16xf32>
    %31 = vector.shape_cast %30 : vector<16xf32> to vector<16x1xf32>
    %32 = vector.broadcast %31 : vector<16x1xf32> to vector<16x4xf32>
    %33 = arith.subf %29, %32 : vector<16x4xf32>
    %34 = math.exp %33 : vector<16x4xf32>
    %cst_9 = arith.constant dense<0.000000e+00> : vector<16xf32>
    %35 = vector.multi_reduction <add>, %34, %cst_9 [1] : vector<16x4xf32> to vector<16xf32>
    %36 = vector.shape_cast %35 : vector<16xf32> to vector<16x1xf32>
    %37 = math.log %36 : vector<16x1xf32>
    %38 = vector.broadcast %37 : vector<16x1xf32> to vector<16x4xf32>
    %39 = arith.subf %33, %38 : vector<16x4xf32>
    %cst_10 = arith.constant 0.000000e+00 : f32
    %40 = vector.broadcast %cst_10 : f32 to vector<16x128xf32>
    %c0_11 = arith.constant 0 : index
    %c0_12 = arith.constant 0 : index
    %41 = vector.load %arg1[%c0_11, %c0_12] : memref<16x128xf32, #tpu.memory_space<vmem>>, vector<16x128xf32>
    tpu.vector_store %arg1[%c0_11, %c0_12], %40 {strides = array<i32>} : memref<16x128xf32, #tpu.memory_space<vmem>>, vector<16x128xf32>,
    %c0_13 = arith.constant 0 : index
    %c0_14 = arith.constant 0 : index
    %42 = vector.load %arg1[%c0_13, %c0_14] : memref<16x128xf32, #tpu.memory_space<vmem>>, vector<16x2xf32>
    tpu.vector_store %arg1[%c0_13, %c0_14], %23 {strides = array<i32>} : memref<16x128xf32, #tpu.memory_space<vmem>>, vector<16x2xf32>,
    %c0_15 = arith.constant 0 : index
    %c2 = arith.constant 2 : index
    %43 = vector.load %arg1[%c0_15, %c2] : memref<16x128xf32, #tpu.memory_space<vmem>>, vector<16x4xf32>
    tpu.vector_store %arg1[%c0_15, %c2], %39 {strides = array<i32>} : memref<16x128xf32, #tpu.memory_space<vmem>>, vector<16x4xf32>,
    return
  }
}

</mosaic_0001>

<bundles_post_ra>
// kernel: _lambda_.1
= control target key start
LH: loop header
LB: loop body
LE: loop exit
PB: predicated region body
PF: predicated region fallthrough
CT: control target
= control target key end

     0   :  { %s904_s10 = smov 112   ;;  %vm21_vm0 = vcmask 64512   ;;  %vm105_vm1 = vcmask 130048   ;;  %v101_v8 = vlaneseq  ;;  %s905_s19 = smov 96   ;;  %vm203_vm2 = vcmask 261120   ;;  %s994_s0 = inlined_call_operand.vmem [shape: f32[56,128], index: 0, kind: input, shape index: {}]   ;;  %s995_s1 = inlined_call_operand.vmem [shape: f32[16,128], index: 1, kind: output, shape index: {}]  }
   0x1   :  { %v923_v0 = vld [vmem:[%s994_s0] sm:$0xff]  ;;  %v928_v1 = vld [vmem:[%s994_s0 + $0x10] sm:$0xff]  ;;  %v935_v2 = vld [vmem:[%s994_s0 + $0x8] sm:$0xff]  ;;  %vm375_vm3 = vcmask 1043456   ;;  %vm368_vm4 = vcmask 31744   ;;  %s907_s22 = smov 90  }
   0x2   :  { %17 = vrot.lane.b32.xlu0 %v923_v0, %s904_s10  ;;  %790 = vmatprep.subr.mxu0 %v928_v1  ;;  %v11_v5 = vld [vmem:[%s994_s0 + $0x18] sm:$0xff]  ;;  %v12_v6 = vld [vmem:[%s994_s0 + $0x20] sm:$0xff]  ;;  %v13_v7 = vld [vmem:[%s994_s0 + $0x28] sm:$0xff]  ;;  %v102_v10 = vshrl.u32 %v101_v8, 7  ;;  %vm542_vm5 = vcmask 1041408   ;;  %v908_v47 = vmov 0.0  }
   0x3   :  { %791 = vmatpush3.msra.mxu0 %v928_v1  ;;  %799 = vmatprep.mubr.msk.f32.mxu1 %vm105_vm1, %v923_v0  ;;  %v874_v9 = vpack.i.bf16 %v11_v5, %v928_v1  ;;  %v879_v11 = vpack.i.bf16 %v13_v7, %v12_v6  ;;  %v14_v12 = vld [vmem:[%s994_s0 + $0x30] sm:$0xff]  ;;  %s906_s0 = smov 92   ;;  %723 = vst [vmem:[%s995_s1 + $0x8] sm:$0xff] %v908_v47  ;;  %722 = vst [vmem:[%s995_s1] sm:$0xff] %v908_v47  ;;  %vm535_vm6 = vcmask 15360   ;;  %s909_s2 = smov 2   ;;  %vm734_vm7 = vcmask 48144  }
   0x4   :  { %v103_v13 = vsub.s32 0, %v102_v10 }
   0x5   :  { %875 = vrot.lane.b32.xlu1 %v874_v9, %s905_s19 }
   0x6   :  { %19 = vrot.lane.b32.xlu0 %v935_v2, %s904_s10  ;;  %v104_v14 = vrot.slane %v14_v12, %v103_v13 }
   0x9   :  { %880 = vrot.lane.b32.xlu1 %v879_v11, %s905_s19 }
   0xa   :  { %286 = vrot.lane.b32.xlu0 %v104_v14, %s905_s19 }
   0xd   :  { %366 = vrot.lane.b32.xlu1 %v928_v1, %s906_s0 }
   0xe   :  { %453 = vrot.lane.b32.xlu0 %v104_v14, %s906_s0 }
  0x11   :  { %533 = vrot.lane.b32.xlu1 %v928_v1, %s907_s22 }
  0x12   :  { %620 = vrot.lane.b32.xlu0 %v104_v14, %s907_s22 }
  0x74   :  { %v18_v3 = vpop.permute.xlu0 %17 }
  0x75   :  { %792 = vmatprep.mubr.msk.f32.mxu0 %vm21_vm0, %v18_v3 }
  0x77   :  { %v876_v18 = vpop.permute.xlu1 %875 }
  0x78   :  { %v20_v4 = vpop.permute.xlu0 %19  ;;  %v878_v19 = vunpack.i.h.bf16 %v876_v18  ;;  %v877_v20 = vunpack.i.l.bf16 %v876_v18 }
  0x79   :  { %793 = vmatmul.mubr.msk.f32.vlgmr.msra.gmra.mrb[0].mxu0 %vm21_vm0, %v20_v4 }
  0x7a   :  { %v848_v21 = vpack.c.bf16 %v878_v19, %v877_v20 }
  0x7b   :  { %v881_v22 = vpop.permute.xlu1 %880 }
  0x7c   :  { %v883_v23 = vunpack.i.h.bf16 %v881_v22  ;;  %v882_v24 = vunpack.i.l.bf16 %v881_v22  ;;  %849 = vmatprep.subr.bf16.mxu0 %v848_v21  ;;  %v287_v36 = vpop.permute.xlu0 %286 }
  0x7d   :  { %851 = vmatpush3.bf16.msra.mxu0 %v848_v21 }
  0x7e   :  { %v852_v25 = vpack.c.bf16 %v883_v23, %v882_v24 }
  0x7f   :  { %v367_v35 = vpop.permute.xlu1 %366 }
  0x80   :  { %853 = vmatprep.subr.bf16.mxu0 %v852_v25  ;;  %v454_v48 = vpop.permute.xlu0 %453 }
  0x81   :  { %855 = vmatpush3.bf16.msra.mxu0 %v852_v25 }
  0x83   :  { %v534_v46 = vpop.permute.xlu1 %533 }
  0x84   :  { %v621_v58 = vpop.permute.xlu0 %620 }
 0x14c   :  { %v794_v15 = vpop.f32.mrb[0].mxu0 }
 0x14d   :  { %v92_v16 = vpop.f32.mrb[1].mxu0 }
 0x14e   :  { %v844_v17 = vpack.c.bf16 %v794_v15, %v92_v16 }
 0x150   :  { %845 = vmatprep.subr.bf16.mxu1 %v844_v17 }
 0x151   :  { %847 = vmatpush3.bf16.msra.mxu1 %v844_v17 }
 0x154   :  { %800 = vmatmul.mubr.msk.f32.vlgmr.msra.gmra.mrb[0].mxu1 %vm105_vm1, %v935_v2 }
 0x155   :  { %817 = vmatprep.mubr.msk.f32.mxu1 %vm105_vm1, %v923_v0 }
 0x227   :  { %v801_v26 = vpop.f32.mrb[0].mxu1 }
 0x228   :  { %v182_v27 = vadd.f32 %v801_v26, %v104_v14  ;;  %v176_v28 = vpop.f32.mrb[1].mxu1 }
 0x229   :  { %v177_v29 = vadd.f32 %v176_v28, %v104_v14 }
 0x22b   :  { %884 = vtanh.f32 %v177_v29 }
 0x22c   :  { %886 = vtanh.f32 %v182_v27 }
 0x235   :  { %v885_v30 = vpop.eup %884 }
 0x236   :  { %v887_v31 = vpop.eup %886  ;;  %810 = vmatprep.mubr.msk.f32.mxu0 %vm203_vm2, %v885_v30 }
 0x237   :  { %811 = vmatmul.mubr.msk.f32.vlgmr.msra.gmra.mrb[2].mxu0 %vm203_vm2, %v887_v31 }
 0x238   :  { %829 = vmatprep.mubr.msk.f32.mxu0 %vm105_vm1, %v923_v0 }
 0x30a   :  { %v812_v32 = vpop.f32.mrb[2].mxu0 }
 0x30b   :  { %v276_v33 = vpop.f32.mrb[3].mxu0 }
 0x30c   :  { %v856_v34 = vpack.c.bf16 %v812_v32, %v276_v33 }
 0x30e   :  { %857 = vmatprep.subr.bf16.mxu1 %v856_v34 }
 0x30f   :  { %859 = vmatpush3.bf16.msra.mxu1 %v856_v34 }
 0x310   :  { %820 = vmatprep.subr.msk.mxu1 %vm375_vm3, %v367_v35 }
 0x312   :  { %818 = vmatmul.mubr.msk.f32.vlgmr.msra.gmra.mrb[2].mxu1 %vm105_vm1, %v935_v2 }
 0x313   :  { %821 = vmatpush3.msk.msra.mxu1 %vm375_vm3, %v367_v35 }
 0x314   :  { %832 = vmatprep.subr.msk.mxu1 %vm542_vm5, %v534_v46 }
 0x3e5   :  { %v819_v37 = vpop.f32.mrb[2].mxu1 }
 0x3e6   :  { %v361_v38 = vadd.f32 %v819_v37, %v287_v36  ;;  %v355_v39 = vpop.f32.mrb[3].mxu1 }
 0x3e7   :  { %v356_v40 = vadd.f32 %v355_v39, %v287_v36 }
 0x3e9   :  { %888 = vtanh.f32 %v356_v40 }
 0x3ea   :  { %890 = vtanh.f32 %v361_v38 }
 0x3f3   :  { %v889_v41 = vpop.eup %888 }
 0x3f4   :  { %v891_v42 = vpop.eup %890  ;;  %822 = vmatprep.mubr.msk.f32.mxu1 %vm368_vm4, %v889_v41 }
 0x3f5   :  { %823 = vmatmul.mubr.msk.f32.vlgmr.msra.gmra.mrb[4].mxu1 %vm368_vm4, %v891_v42 }
 0x3f6   :  { %833 = vmatpush3.msk.msra.mxu1 %vm542_vm5, %v534_v46 }
 0x4c8   :  { %v824_v43 = vpop.f32.mrb[4].mxu1 }
 0x4c9   :  { %v444_v44 = vpop.f32.mrb[5].mxu1 }
 0x4ca   :  { %v860_v45 = vpack.c.bf16 %v824_v43, %v444_v44 }
 0x4cc   :  { %861 = vmatprep.subr.bf16.mxu0 %v860_v45 }
 0x4cd   :  { %863 = vmatpush3.bf16.msra.mxu0 %v860_v45 }
 0x4d0   :  { %830 = vmatmul.mubr.msk.f32.vlgmr.msra.gmra.mrb[4].mxu0 %vm105_vm1, %v935_v2 }
 0x4d1   :  { %841 = vmatprep.mubr.msk.f32.mxu0 %vm105_vm1, %v923_v0 }
 0x5a3   :  { %v831_v49 = vpop.f32.mrb[4].mxu0 }
 0x5a4   :  { %v528_v50 = vadd.f32 %v831_v49, %v454_v48  ;;  %v522_v51 = vpop.f32.mrb[5].mxu0 }
 0x5a5   :  { %v523_v52 = vadd.f32 %v522_v51, %v454_v48 }
 0x5a6   :  { %892 = vtanh.f32 %v528_v50 }
 0x5a7   :  { %894 = vtanh.f32 %v523_v52 }
 0x5b0   :  { %v893_v53 = vpop.eup %892 }
 0x5b1   :  { %v895_v54 = vpop.eup %894  ;;  %725 = vst.msk [vmem:[%s995_s1 + $0x8] sm:$0xff] %vm535_vm6, %v893_v53 }
 0x5b2   :  { %834 = vmatprep.mubr.msk.f32.mxu1 %vm535_vm6, %v895_v54  ;;  %724 = vst.msk [vmem:[%s995_s1] sm:$0xff] %vm535_vm6, %v895_v54 }
 0x5b3   :  { %835 = vmatmul.mubr.msk.f32.vlgmr.msra.gmra.mrb[6].mxu1 %vm535_vm6, %v893_v53 }
 0x686   :  { %v836_v55 = vpop.f32.mrb[6].mxu1 }
 0x687   :  { %v611_v56 = vpop.f32.mrb[7].mxu1 }
 0x688   :  { %v864_v57 = vpack.c.bf16 %v836_v55, %v611_v56 }
 0x68a   :  { %865 = vmatprep.subr.bf16.mxu0 %v864_v57 }
 0x68b   :  { %867 = vmatpush3.bf16.msra.mxu0 %v864_v57 }
 0x68e   :  { %842 = vmatmul.mubr.msk.f32.vlgmr.msra.gmra.mrb[6].mxu0 %vm105_vm1, %v935_v2 }
 0x761   :  { %v843_v59 = vpop.f32.mrb[6].mxu0 }
 0x762   :  { %v695_v60 = vadd.f32 %v843_v59, %v621_v58  ;;  %v689_v61 = vpop.f32.mrb[7].mxu0 }
 0x763   :  { %v690_v62 = vadd.f32 %v689_v61, %v621_v58 }
 0x764   :  { %v701_v63 = vsel %vm368_vm4, %v695_v60, -inf }
 0x765   :  { %702 = vmax.xlane.f32.xlu0 %v701_v63  ;;  %v698_v0 = vsel %vm368_vm4, %v690_v62, -inf }
 0x766   :  { %699 = vmax.xlane.f32.xlu1 %v698_v0 }
 0x7f2   :  { %v703_v1 = vpop.xlane.xlu0 %702 }
 0x7f3   :  { %v705_v3 = vsub.f32 %v695_v60, %v703_v1  ;;  %v700_v4 = vpop.xlane.xlu1 %699 }
 0x7f4   :  { %v704_v5 = vsub.f32 %v690_v62, %v700_v4 }
 0x7f5   :  { %v708_v6 = vmul.f32 1.442695, %v705_v3 }
 0x7f6   :  { %v706_v7 = vmul.f32 1.442695, %v704_v5 }
 0x7f7   :  { %896 = vpow2.f32 %v708_v6 }
 0x7f8   :  { %898 = vpow2.f32 %v706_v7 }
 0x801   :  { %v897_v2 = vpop.eup %896 }
 0x802   :  { %v899_v8 = vpop.eup %898  ;;  %v713_v9 = vsel %vm368_vm4, %v897_v2, 0.0 }
 0x803   :  { %714 = vadd.xlane.f32.xlu1 %v713_v9  ;;  %v710_v10 = vsel %vm368_vm4, %v899_v8, 0.0 }
 0x804   :  { %711 = vadd.xlane.f32.xlu0 %v710_v10 }
 0x890   :  { %v715_v11 = vpop.xlane.xlu1 %714 }
 0x891   :  { %900 = vlog2.f32 %v715_v11  ;;  %v712_v12 = vpop.xlane.xlu0 %711 }
 0x892   :  { %902 = vlog2.f32 %v712_v12 }
 0x89b   :  { %v901_v13 = vpop.eup %900 }
 0x89c   :  { %v903_v14 = vpop.eup %902  ;;  %v719_v15 = vmul.f32 0.6931472, %v901_v13 }
 0x89d   :  { %v717_v16 = vmul.f32 0.6931472, %v903_v14 }
 0x89e   :  { %v721_v17 = vsub.f32 %v705_v3, %v719_v15 }
 0x89f   :  { %v720_v18 = vsub.f32 %v704_v5, %v717_v16 }
 0x8a0   :  { %730 = vrot.lane.b32.xlu1 %v721_v17, %s909_s2 }
 0x8a1   :  { %728 = vrot.lane.b32.xlu0 %v720_v18, %s909_s2 }
 0x912   :  { %v731_v19 = vpop.permute.xlu1 %730 }
 0x913   :  { %736 = vst.msk [vmem:[%s995_s1 + $0x8] sm:$0xff] %vm734_vm7, %v731_v19  ;;  %v729_v20 = vpop.permute.xlu0 %728 }
 0x914   :  { %735 = vst.msk [vmem:[%s995_s1] sm:$0xff] %vm734_vm7, %v729_v20 }

</bundles_post_ra>
